<compile_context>
chip_gen: v5e
topology: v5e:2x2
jax: 0.10.0
libtpu: 0.0.40
codegen_flags: <defaults>
</compile_context>

<pallas_src>
import functools

import jax
import jax.numpy as jnp
from jax.experimental import pallas as pl
from jax.experimental.pallas import tpu as pltpu


def _round_up(v, m):
    return ((v + m - 1) // m) * m


def _pow2(e_int):
    """Exact 2**e (float32) built from exponent bits; e must stay in [-126, 127]."""
    return jax.lax.bitcast_convert_type((e_int + 127) << 23, jnp.float32)


def _positize(x, bit_size, es_size):
    """Round float32 values to the nearest posit<bit_size, es_size> grid point.

    Pure jnp -> usable both inside Pallas kernels and as a plain-JAX
    reference. Zeros map to zero; nonzero magnitudes are clamped to
    [minpos, maxpos] (posits never round a nonzero value to 0 or inf).
    All scale factors are exact powers of two built via exponent-bit
    construction; the mantissa-quantization step is fused into a single
    2**(fbits - E) scale pair, and the sign is restored with a bit OR.
    """
    # TODO(synk): exact posit round-to-nearest-even at regime/exponent-field
    # truncation boundaries and NaR (NaN) handling; this uses the standard
    # fraction-rounding scheme.
    n = bit_size
    es = es_size
    two_pow_es = 1 << es
    max_k = n - 2
    maxpos = jnp.float32(2.0 ** (two_pow_es * max_k))
    minpos = jnp.float32(2.0 ** (-(two_pow_es * max_k)))

    a = jnp.clip(jnp.abs(x), minpos, maxpos)

    # Exact exponent extraction via bit twiddling (a is always a normal f32).
    bits = jax.lax.bitcast_convert_type(a, jnp.int32)
    E = ((bits >> 23) & 0xFF) - 127                 # unbiased exponent

    k = E >> es                                     # arithmetic shift == floor(E / 2**es)
    regime_len = jnp.where(k >= 0, k + 2, 1 - k)    # regime field length in bits
    fbits = jnp.maximum(n - 1 - es - regime_len, 0)  # available fraction bits

    # Quantization grid spacing is 2**(E - fbits); both scales are exact.
    d = fbits - E
    q = jnp.round(a * _pow2(d)) * _pow2(-d)
    v = jnp.clip(q, minpos, maxpos)

    # Restore sign via the sign bit of x (copysign), then map exact zeros to 0.
    sign = jax.lax.bitcast_convert_type(x, jnp.int32) & jnp.int32(-2147483648)
    v_signed = jax.lax.bitcast_convert_type(
        jax.lax.bitcast_convert_type(v, jnp.int32) | sign, jnp.float32)
    return jnp.where(x == 0.0, jnp.float32(0.0), v_signed)


# --------------------------------------------------------------------------
# Stage 1: tiled element-wise posit quantization (mem-bound VPU passes).
# --------------------------------------------------------------------------
def _positize_kernel(x_ref, o_ref, *, bit_size, es_size):
    o_ref[...] = _positize(x_ref[...], bit_size, es_size).astype(o_ref.dtype)


def _positize_transpose_kernel(w_ref, o_ref, *, bit_size, es_size):
    # Quantize AND transpose here (one-time, mem-bound pass: XLU slot is idle)
    # so the matmul k-loop gets an MXU-native (K, N) RHS and stays pure vmatmul.
    o_ref[...] = _positize(w_ref[...], bit_size, es_size).T.astype(o_ref.dtype)


def _positize_array(arr, br, bc, bit_size, es_size, out_dtype):
    """Posit-quantize a padded 2D array, tiled (br, bc)."""
    R, C = arr.shape
    kernel = functools.partial(_positize_kernel, bit_size=bit_size, es_size=es_size)
    return pl.pallas_call(
        kernel,
        out_shape=jax.ShapeDtypeStruct((R, C), out_dtype),
        grid_spec=pltpu.PrefetchScalarGridSpec(
            num_scalar_prefetch=0,
            grid=(R // br, C // bc),
            in_specs=[pl.BlockSpec((br, bc), lambda i, j: (i, j))],
            out_specs=pl.BlockSpec((br, bc), lambda i, j: (i, j)),
        ),
        compiler_params=pltpu.CompilerParams(
            dimension_semantics=("parallel", "parallel")),
    )(arr)


def _positize_transpose_array(arr, br, bc, bit_size, es_size, out_dtype):
    """Posit-quantize a padded 2D array (R, C) and emit it transposed (C, R)."""
    R, C = arr.shape
    kernel = functools.partial(
        _positize_transpose_kernel, bit_size=bit_size, es_size=es_size)
    return pl.pallas_call(
        kernel,
        out_shape=jax.ShapeDtypeStruct((C, R), out_dtype),
        grid_spec=pltpu.PrefetchScalarGridSpec(
            num_scalar_prefetch=0,
            grid=(R // br, C // bc),
            in_specs=[pl.BlockSpec((br, bc), lambda i, j: (i, j))],
            out_specs=pl.BlockSpec((bc, br), lambda i, j: (j, i)),
        ),
        compiler_params=pltpu.CompilerParams(
            dimension_semantics=("parallel", "parallel")),
    )(arr)


# --------------------------------------------------------------------------
# Stage 2: tiled matmul. The f32 output block is constant across k, so it is
# resident in VMEM and used directly as the accumulator (no scratch).
# Pre-quantized bias is added at the last k step only.
# --------------------------------------------------------------------------
def _matmul_bias_kernel(xq_ref, wq_ref, bq_ref, o_ref):
    k = pl.program_id(2)
    # xq: (tm, tk) @ wq^T tile: (tk, tn) -> (tm, tn); MXU-native, no transpose.
    partial = jnp.dot(xq_ref[...], wq_ref[...], preferred_element_type=jnp.float32)

    @pl.when(k == 0)
    def _():
        o_ref[...] = partial

    @pl.when(k > 0)
    def _():
        o_ref[...] += partial

    @pl.when(k == pl.num_programs(2) - 1)
    def _():
        o_ref[...] += bq_ref[...]        # (1, tn) f32, broadcast over rows


def positized_linear(x, weight, bias, bit_size, es_size, *, tm=None, tn=None, tk=None):
    """y = positize(x) @ positize(W).T + positize(b), all float32 in/out."""
    x = x.astype(jnp.float32)
    weight = weight.astype(jnp.float32)
    bias = bias.astype(jnp.float32)

    M, K = x.shape
    N, K2 = weight.shape
    assert K == K2 and bias.shape == (N,)

    # Generation-aware VMEM budget (v5e/v6e: 128 MiB, v7x: 64 MiB per core).
    try:
        vmem_cap = int(getattr(pltpu.get_tpu_info(), "vmem_capacity_bytes", 64 << 20))
    except Exception:  # pragma: no cover - conservative fallback
        vmem_cap = 64 << 20
    small_vmem = vmem_cap <= (64 << 20)   # v7x-like: 64 MiB, dual TensorCore

    # bf16 storage of the quantized operands is lossless iff the max posit
    # fraction width (bit_size - 3 - es_size) fits bf16's 7 fraction bits and
    # the posit exponent range fits bf16's exponent range.
    lossless_bf16 = (bit_size - 3 - es_size) <= 7 and (1 << es_size) * (bit_size - 2) <= 126
    q_dtype = jnp.bfloat16 if lossless_bf16 else jnp.float32
    q_bytes = jnp.dtype(q_dtype).itemsize

    # HBM reuse ~ tm*tn/(tm+tn) flop/byte: 2048x1024 gives ~683 (enough for
    # v6e/v7x rooflines) and, with no acc scratch, fits v7x's 64 MiB VMEM.
    # tk stays a multiple of 256 (MXU depth); it does not affect reuse.
    if tm is None:
        tm = 2048
    if tn is None:
        tn = 1024
    if tk is None:
        tk = 512

    # Shrink tiles for small problems, keeping the (8, 128) TPU minimum tile.
    tm = min(tm, _round_up(M, 8))
    tn = min(tn, _round_up(N, 128))
    tk = min(tk, _round_up(K, 128))

    # v7x has 2 TensorCores sharded over the parallel grid axes: make sure the
    # output grid has at least 2 blocks so neither core idles.
    if small_vmem and (-(-M // tm)) * (-(-N // tn)) < 2 and _round_up(M, 8) >= 16:
        tm = _round_up(_round_up(M, 8) // 2, 8)

    Mp, Np, Kp = _round_up(M, tm), _round_up(N, tn), _round_up(K, tk)

    # Zero padding is exact: positize(0) == 0, so pads contribute nothing.
    # TODO(synk): for very ragged shapes, fold the padding into the positize
    # pass to avoid the extra f32 HBM round-trip of jnp.pad.
    xp = jnp.pad(x, ((0, Mp - M), (0, Kp - K)))
    wp = jnp.pad(weight, ((0, Np - N), (0, Kp - K)))
    bp = jnp.pad(bias, (0, Np - N)).reshape(1, Np)

    # Element-wise pass block shapes are decoupled from matmul tiles: >= 512
    # wide where the padded dims allow it (HBM roofline for mem-bound passes).
    bxr = 512 if tm % 512 == 0 else tm
    bxc = 512 if tk % 512 == 0 else tk
    bwr = 512 if tn % 512 == 0 else tn
    bwc = 512 if tk % 512 == 0 else tk

    # Pre-quantize once so positize is never re-run inside the matmul loop.
    xq = _positize_array(xp, bxr, bxc, bit_size, es_size, q_dtype)              # (Mp, Kp)
    wq_t = _positize_transpose_array(wp, bwr, bwc, bit_size, es_size, q_dtype)  # (Kp, Np)
    bq = _positize_array(bp, 1, Np, bit_size, es_size, jnp.float32)             # (1, Np)

    grid = (Mp // tm, Np // tn, Kp // tk)

    vmem_need = (2 * (tm + tn) * tk * q_bytes   # double-buffered input tiles
                 + 2 * tm * tn * 4              # resident + writeback output tile
                 + 2 * tn * 4                   # bias tile
                 + (6 << 20))                   # Mosaic internal scratch headroom
    vmem_limit = int(min(max(vmem_need, 32 << 20), vmem_cap))

    cost = pl.CostEstimate(
        flops=2 * Mp * Np * Kp,
        transcendentals=0,
        bytes_accessed=(Mp * Kp + Np * Kp) * q_bytes + Mp * Np * 4 + Np * 4)

    y = pl.pallas_call(
        _matmul_bias_kernel,
        out_shape=jax.ShapeDtypeStruct((Mp, Np), jnp.float32),
        grid_spec=pltpu.PrefetchScalarGridSpec(
            num_scalar_prefetch=0,
            grid=grid,
            in_specs=[
                pl.BlockSpec((tm, tk), lambda i, j, k: (i, k)),   # x tile
                pl.BlockSpec((tk, tn), lambda i, j, k: (k, j)),   # W^T tile (IN, OUT)
                pl.BlockSpec((1, tn), lambda i, j, k: (0, j)),    # bias tile
            ],
            out_specs=pl.BlockSpec((tm, tn), lambda i, j, k: (i, j)),
        ),
        compiler_params=pltpu.CompilerParams(
            dimension_semantics=("parallel", "parallel", "arbitrary"),
            vmem_limit_bytes=vmem_limit),
        cost_estimate=cost,
    )(xq, wq_t, bq)

    return y[:M, :N]


if __name__ == "__main__":
    # Small shapes consistent with the module: Linear(in=32, out=16), batch=8.
    batch, in_features, out_features = 8, 32, 16
    bit_size, es_size = 8, 1

    key = jax.random.PRNGKey(0)
    kx, kw, kb = jax.random.split(key, 3)

    x = jax.random.normal(kx, (batch, in_features), dtype=jnp.float32)
    # Deterministic nn.Linear-style init: U(-1/sqrt(fan_in), 1/sqrt(fan_in)).
    bound = 1.0 / (in_features ** 0.5)
    weight = jax.random.uniform(
        kw, (out_features, in_features), minval=-bound, maxval=bound, dtype=jnp.float32
    )
    bias = jax.random.uniform(
        kb, (out_features,), minval=-bound, maxval=bound, dtype=jnp.float32
    )

    y = positized_linear(x, weight, bias, bit_size, es_size)
    y = jax.block_until_ready(y)

    # Plain-JAX reference of the same forward pass (f32 throughout).
    y_ref = (
        jnp.dot(
            _positize(x, bit_size, es_size),
            _positize(weight, bit_size, es_size).T,
            precision=jax.lax.Precision.HIGHEST,
        )
        + _positize(bias, bit_size, es_size)[None, :]
    )
    assert y.shape == (batch, out_features)
    assert jnp.allclose(y, y_ref, atol=1e-5, rtol=1e-5), "mismatch vs reference"

    print("KERNEL_OK")
</pallas_src>

<mosaic_0001>
module attributes {stable_mosaic.version = 11 : i64} {
  func.func @_positize_kernel(%arg0: i32, %arg1: i32, %arg2: memref<8x128xf32, #tpu.memory_space<vmem>>, %arg3: memref<8x128xbf16, #tpu.memory_space<vmem>>) attributes {dimension_semantics = [#tpu.dimension_semantics<parallel>, #tpu.dimension_semantics<parallel>], iteration_bounds = array<i64: 1, 1>, scalar_prefetch = 0 : i64, scratch_operands = 0 : i64, tpu.core_type = #tpu.core_type<tc>, window_params = [{transform_indices = @transform_0, window_bounds = array<i64: 8, 128>}, {transform_indices = @transform_1, window_bounds = array<i64: 8, 128>}]} {
    %c0 = arith.constant 0 : index
    %c0_0 = arith.constant 0 : index
    %0 = vector.load %arg2[%c0, %c0_0] : memref<8x128xf32, #tpu.memory_space<vmem>>, vector<8x128xf32>
    %1 = math.absf %0 : vector<8x128xf32>
    %cst = arith.constant 2.44140625E-4 : f32
    %cst_1 = arith.constant 4.096000e+03 : f32
    %2 = vector.broadcast %cst : f32 to vector<8x128xf32>
    %3 = arith.maximumf %2, %1 : vector<8x128xf32>
    %4 = vector.broadcast %cst_1 : f32 to vector<8x128xf32>
    %5 = arith.minimumf %4, %3 : vector<8x128xf32>
    %6 = tpu.bitcast %5 : vector<8x128xf32> -> vector<8x128xi32>
    %c23_i32 = arith.constant 23 : i32
    %7 = vector.broadcast %c23_i32 : i32 to vector<8x128xi32>
    %8 = arith.shrsi %6, %7 : vector<8x128xi32>
    %c255_i32 = arith.constant 255 : i32
    %9 = vector.broadcast %c255_i32 : i32 to vector<8x128xi32>
    %10 = arith.andi %8, %9 : vector<8x128xi32>
    %c127_i32 = arith.constant 127 : i32
    %11 = vector.broadcast %c127_i32 : i32 to vector<8x128xi32>
    %12 = arith.subi %10, %11 : vector<8x128xi32>
    %c1_i32 = arith.constant 1 : i32
    %13 = vector.broadcast %c1_i32 : i32 to vector<8x128xi32>
    %14 = arith.shrsi %12, %13 : vector<8x128xi32>
    %c0_i32 = arith.constant 0 : i32
    %15 = vector.broadcast %c0_i32 : i32 to vector<8x128xi32>
    %16 = arith.cmpi sge, %14, %15 : vector<8x128xi32>
    %c2_i32 = arith.constant 2 : i32
    %17 = vector.broadcast %c2_i32 : i32 to vector<8x128xi32>
    %18 = arith.addi %14, %17 : vector<8x128xi32>
    %c1_i32_2 = arith.constant 1 : i32
    %19 = vector.broadcast %c1_i32_2 : i32 to vector<8x128xi32>
    %20 = arith.subi %19, %14 : vector<8x128xi32>
    %21 = arith.select %16, %18, %20 : vector<8x128xi1>, vector<8x128xi32>
    %c6_i32 = arith.constant 6 : i32
    %22 = vector.broadcast %c6_i32 : i32 to vector<8x128xi32>
    %23 = arith.subi %22, %21 : vector<8x128xi32>
    %c0_i32_3 = arith.constant 0 : i32
    %24 = vector.broadcast %c0_i32_3 : i32 to vector<8x128xi32>
    %25 = arith.maxsi %23, %24 : vector<8x128xi32>
    %26 = arith.subi %25, %12 : vector<8x128xi32>
    %c127_i32_4 = arith.constant 127 : i32
    %27 = vector.broadcast %c127_i32_4 : i32 to vector<8x128xi32>
    %28 = arith.addi %26, %27 : vector<8x128xi32>
    %c23_i32_5 = arith.constant 23 : i32
    %29 = vector.broadcast %c23_i32_5 : i32 to vector<8x128xi32>
    %30 = arith.shli %28, %29 : vector<8x128xi32>
    %31 = tpu.bitcast %30 : vector<8x128xi32> -> vector<8x128xf32>
    %32 = arith.mulf %5, %31 : vector<8x128xf32>
    %33 = math.roundeven %32 : vector<8x128xf32>
    %c0_i32_6 = arith.constant 0 : i32
    %34 = vector.broadcast %c0_i32_6 : i32 to vector<8x128xi32>
    %35 = arith.subi %34, %26 : vector<8x128xi32>
    %c127_i32_7 = arith.constant 127 : i32
    %36 = vector.broadcast %c127_i32_7 : i32 to vector<8x128xi32>
    %37 = arith.addi %35, %36 : vector<8x128xi32>
    %c23_i32_8 = arith.constant 23 : i32
    %38 = vector.broadcast %c23_i32_8 : i32 to vector<8x128xi32>
    %39 = arith.shli %37, %38 : vector<8x128xi32>
    %40 = tpu.bitcast %39 : vector<8x128xi32> -> vector<8x128xf32>
    %41 = arith.mulf %33, %40 : vector<8x128xf32>
    %cst_9 = arith.constant 2.44140625E-4 : f32
    %cst_10 = arith.constant 4.096000e+03 : f32
    %42 = vector.broadcast %cst_9 : f32 to vector<8x128xf32>
    %43 = arith.maximumf %42, %41 : vector<8x128xf32>
    %44 = vector.broadcast %cst_10 : f32 to vector<8x128xf32>
    %45 = arith.minimumf %44, %43 : vector<8x128xf32>
    %46 = tpu.bitcast %0 : vector<8x128xf32> -> vector<8x128xi32>
    %c-2147483648_i32 = arith.constant -2147483648 : i32
    %47 = vector.broadcast %c-2147483648_i32 : i32 to vector<8x128xi32>
    %48 = arith.andi %46, %47 : vector<8x128xi32>
    %49 = tpu.bitcast %45 : vector<8x128xf32> -> vector<8x128xi32>
    %50 = arith.ori %49, %48 : vector<8x128xi32>
    %51 = tpu.bitcast %50 : vector<8x128xi32> -> vector<8x128xf32>
    %cst_11 = arith.constant 0.000000e+00 : f32
    %52 = vector.broadcast %cst_11 : f32 to vector<8x128xf32>
    %53 = arith.cmpf oeq, %0, %52 : vector<8x128xf32>
    %cst_12 = arith.constant 0.000000e+00 : f32
    %54 = vector.broadcast %cst_12 : f32 to vector<8x128xf32>
    %55 = arith.select %53, %54, %51 : vector<8x128xi1>, vector<8x128xf32>
    %56 = arith.truncf %55 : vector<8x128xf32> to vector<8x128xbf16>
    %c0_13 = arith.constant 0 : index
    %c0_14 = arith.constant 0 : index
    %57 = vector.load %arg3[%c0_13, %c0_14] : memref<8x128xbf16, #tpu.memory_space<vmem>>, vector<8x128xbf16>
    tpu.vector_store %arg3[%c0_13, %c0_14], %56 {strides = array<i32>} : memref<8x128xbf16, #tpu.memory_space<vmem>>, vector<8x128xbf16>,
    return
  }
  func.func @transform_0(%arg0: i32, %arg1: i32) -> (i32, i32) {
    %c0_i32 = arith.constant 0 : i32
    return %arg0, %arg1 : i32, i32
  }
  func.func @transform_1(%arg0: i32, %arg1: i32) -> (i32, i32) {
    %c0_i32 = arith.constant 0 : i32
    return %arg0, %arg1 : i32, i32
  }
}

</mosaic_0001>

<bundles_post_ra>
// kernel: tpu_custom_call.1
= control target key start
LH: loop header
LB: loop body
LE: loop exit
PB: predicated region body
PF: predicated region fallthrough
CT: control target
= control target key end

     0   :  { %6 = vsyncpa [#allocation3], 0  ;;  %s159_s0 = inlined_call_operand.hbm [shape: f32[8,128], index: 0, kind: input, shape index: {}]   ;;  %s160_s1 = inlined_call_operand.hbm [shape: bf16[8,128], index: 1, kind: output, shape index: {}]  }
   0x1   :  { %7 = vsyncpa [#allocation4], 0  ;;  %s13_s8 = sshll.u32 %s159_s0, 4  ;;  %s141_s9 = smov [#allocation2]   ;;  %s14_s8 = int_to_ptr.hbm [resolvable:$true] %s13_s8 }
   0x2   :  { %s15_s10 = sshll.u32 %s141_s9, 4  ;;  %s16_s10 = int_to_ptr.vmem [resolvable:$true] %s15_s10 }
   0x3   :  { %18 = dma.hbm_to_vmem [thread:$0]  %s14_s8, 128, %s16_s10, [#allocation3]  }
   0x4   :  { %137 = dma.done.wait [#allocation3], 128  }
   0x5   :  { %138 = vsyncadd [#allocation3], 4294967168  ;;  %v23_v0 = vld [vmem:[#allocation2] sm:$0xff]  ;;  %s142_s0 = smov [#allocation5]   ;;  %s68_s14 = sshll.u32 %s160_s1, 4  ;;  %s69_s14 = int_to_ptr.hbm [resolvable:$true] %s68_s14 }
   0x6   :  { %v24_v1 = vand.u32 2147483647, %v23_v0  ;;  %v53_v29 = vand.u32 2147483648, %v23_v0  ;;  %vm57_vm3 = vcmp.eq.f32.partialorder %v23_v0, 0.0  ;;  %s66_s11 = sshll.u32 %s142_s0, 4  ;;  %s67_s11 = int_to_ptr.vmem [resolvable:$true] %s66_s11 }
   0x8   :  { %v25_v2 = vmax.f32 %v24_v1, 0.00024414063 }
   0xa   :  { %v26_v3 = vmin.f32 %v25_v2, 4096.0 }
   0xc   :  { %v28_v4 = vshra.s32 %v26_v3, 23 }
   0xe   :  { %v29_v5 = vand.u32 255, %v28_v4 }
  0x10   :  { %v78_v6 = vadd.s32 4294967169, %v29_v5 }
  0x12   :  { %v31_v7 = vshra.s32 %v78_v6, 1 }
  0x14   :  { %vm32_vm0 = vcmp.ge.s32.totalorder %v31_v7, 0  ;;  %v33_v8 = vadd.s32 2, %v31_v7  ;;  %v34_v9 = vsub.s32 1, %v31_v7 }
  0x16   :  { %v35_v10 = vsel %vm32_vm0, %v33_v8, %v34_v9 }
  0x17   :  { %v36_v11 = vsub.s32 6, %v35_v10 }
  0x19   :  { %vm37_vm1 = vcmp.gt.s32.totalorder %v36_v11, 0 }
  0x1a   :  { %v38_v12 = vsel %vm37_vm1, %v36_v11, 0 }
  0x1b   :  { %v39_v13 = vsub.s32 %v38_v12, %v78_v6 }
  0x1d   :  { %v40_v14 = vadd.s32 127, %v39_v13  ;;  %v45_v16 = vsub.s32 0, %v39_v13 }
  0x1f   :  { %v41_v15 = vshll.u32 %v40_v14, 23  ;;  %v46_v20 = vadd.s32 127, %v45_v16 }
  0x21   :  { %v43_v17 = vmul.f32 %v41_v15, %v26_v3  ;;  %v47_v24 = vshll.u32 %v46_v20, 23 }
  0x23   :  { %v81_v18 = vcvt.f32.s32 %v43_v17  ;;  %v79_v19 = vand.u32 2147483647, %v43_v17  ;;  %v84_v22 = vand.u32 2147483648, %v43_v17 }
  0x25   :  { %v82_v21 = vcvt.s32.f32 %v81_v18  ;;  %vm80_vm2 = vcmp.lt.f32.partialorder %v79_v19, 8388608.0 }
  0x27   :  { %v83_v23 = vand.u32 2147483647, %v82_v21 }
  0x29   :  { %v85_v25 = vor.u32 %v84_v22, %v83_v23 }
  0x2b   :  { %v86_v26 = vsel %vm80_vm2, %v85_v25, %v43_v17 }
  0x2c   :  { %v49_v27 = vmul.f32 %v86_v26, %v47_v24 }
  0x2e   :  { %v50_v28 = vmax.f32 %v49_v27, 0.00024414063 }
  0x30   :  { %v51_v30 = vmin.f32 %v50_v28, 4096.0 }
  0x32   :  { %v55_v31 = vor.u32 %v53_v29, %v51_v30 }
  0x34   :  { %v58_v32 = vsel %vm57_vm3, 0.0, %v55_v31 }
  0x35   :  { %v59_v33 = vpack.c.bf16 %v58_v32, %v58_v32 }
  0x37   :  { %60 = vst [vmem:[#allocation5] sm:$0xf] %v59_v33 }
  0x38   :  { %71 = dma.vmem_to_hbm [thread:$0]  %s67_s11, 64, %s69_s14, [#allocation4]  }
  0x39   :  { %139 = dma.done.wait [#allocation4], 64  }
  0x3a   :  { %140 = vsyncadd [#allocation4], 4294967232 }
  0x3b   :  { %76 = vsyncpa [#allocation3], 1 }
  0x3c   :  { %77 = vsyncpa [#allocation4], 1 }

</bundles_post_ra>
